<compile_context>
chip_gen: v6e
topology: v6e:2x2x1
jax: 0.10.0
libtpu: 0.0.40
codegen_flags: <defaults>
</compile_context>

<pallas_src>
import functools
import math

import jax
import jax.numpy as jnp
from jax.experimental import pallas as pl
from jax.experimental.pallas import tpu as pltpu


_TILE_BYTES_TARGET = 4 * 1024 * 1024   # target (in + out) bytes per grid step
_SPLIT_MIN_BYTES = 2 * 1024 * 1024     # split single-tile cases >= this (v7x 2-TC sharding)
_MAX_GROUP = 16                        # max row-group factor for lane-dense output


def _sublane_rows(dtype) -> int:
    """Minimum sublane tile (rows) for the dtype's packing."""
    itemsize = jnp.dtype(dtype).itemsize
    return {4: 8, 2: 16, 1: 32}.get(itemsize, 8)


def _row_tile(n_rows: int, row_bytes: int, sublane: int) -> int:
    """Rows per grid step: byte-targeted, sublane-aligned, >=2 steps when big."""
    rows = max(sublane, _TILE_BYTES_TARGET // max(row_bytes, 1))
    if rows >= n_rows:
        # Whole array fits one step.  Split into two sublane-aligned steps when
        # there is enough data that the extra ~0.35us step is cheap, so the
        # "parallel" grid axis can shard across v7x's two TensorCores.
        if n_rows >= 2 * sublane and n_rows * row_bytes >= _SPLIT_MIN_BYTES:
            half = -(-n_rows // 2)
            return -(-half // sublane) * sublane
        return n_rows
    return max(sublane, (rows // sublane) * sublane)


# ----------------------------- kernels -------------------------------------


def _copy_kernel(z_ref, out_ref):
    # Slice already done by the input BlockSpec (only needed lanes were DMA'd).
    out_ref[...] = z_ref[...]


def _slice_kernel(z_ref, out_ref, *, state_dim):
    # Identity per timestep on z[t, :state_dim]: static lane slice + tile copy.
    out_ref[...] = z_ref[:, :state_dim]


def _group_kernel(z_ref, out_ref, *, g, hidden_dim, state_dim):
    # Row-group repack: g timesteps per (lane-dense) output row.
    # out[r, j*sd:(j+1)*sd] = z[r*g + j, :sd]   (static lane slices only).
    for j in range(g):
        out_ref[:, j * state_dim:(j + 1) * state_dim] = (
            z_ref[:, j * hidden_dim:j * hidden_dim + state_dim])


# ----------------------------- wrapper --------------------------------------


def decoder_forward(z: jax.Array, state_dim: int) -> jax.Array:
    """JAX/Pallas equivalent of Decoder.forward: returns z[:, :state_dim]."""
    T, hidden_dim = z.shape
    assert 0 < state_dim <= hidden_dim
    dtype = z.dtype
    itemsize = jnp.dtype(dtype).itemsize
    sublane = _sublane_rows(dtype)

    # Fast path: Identity over the full feature dim -> no data movement at all.
    if state_dim == hidden_dim:
        return z

    # TODO(synk): inside a larger model, a plain `z[:, :state_dim]` XLA slice
    # would fuse into its consumer and may never materialize; the Pallas kernel
    # below is the explicit, standalone-materialization path.

    ceil128 = lambda n: -(-n // 128) * 128

    g = 0
    if state_dim % 128 == 0:
        in_w, needs_slice = state_dim, False                 # exact lane-restricted read
    elif hidden_dim % 128 == 0:
        in_w, needs_slice = min(ceil128(state_dim), hidden_dim), True
        # TODO(synk): output lanes remain sparse here (state_dim < 128); a
        # row-group repack would trade extra input read bytes for dense stores.
    else:
        in_w, needs_slice = hidden_dim, True                 # must read the full row
        gg = 128 // math.gcd(state_dim, 128)
        if state_dim < 128 and gg <= _MAX_GROUP and T % gg == 0:
            g = gg                                           # lane-dense output path

    if g:
        # View g consecutive timesteps as one wide row (contiguous reshape =
        # free) so the output block is 128-lane dense.
        n_rows = T // g
        in_w, out_w = g * hidden_dim, g * state_dim
        kernel = functools.partial(
            _group_kernel, g=g, hidden_dim=hidden_dim, state_dim=state_dim)
        z_in = z.reshape(n_rows, in_w)
    else:
        n_rows, out_w = T, state_dim
        kernel = (functools.partial(_slice_kernel, state_dim=state_dim)
                  if needs_slice else _copy_kernel)
        z_in = z  # lane restriction (if any) is done by the input BlockSpec

    row_bytes = (in_w + out_w) * itemsize
    tile_rows = _row_tile(n_rows, row_bytes, sublane)
    grid = (pl.cdiv(n_rows, tile_rows),)

    # Double-buffered in+out tiles plus slack; only exceeds 32 MiB for
    # pathologically wide rows.
    vmem_need = 2 * tile_rows * row_bytes + (2 << 20)
    cost = pl.CostEstimate(
        flops=0, transcendentals=0, bytes_accessed=n_rows * row_bytes)

    out = pl.pallas_call(
        kernel,
        out_shape=jax.ShapeDtypeStruct((n_rows, out_w), dtype),
        grid=grid,
        in_specs=[pl.BlockSpec((tile_rows, in_w), lambda i: (i, 0))],
        out_specs=pl.BlockSpec((tile_rows, out_w), lambda i: (i, 0)),
        compiler_params=pltpu.CompilerParams(
            dimension_semantics=("parallel",),
            vmem_limit_bytes=max(32 * 1024 * 1024, vmem_need),
        ),
        cost_estimate=cost,
    )(z_in)

    return out.reshape(T, state_dim) if g else out


if __name__ == "__main__":
    key = jax.random.PRNGKey(0)

    # 1) Small module-shaped example: seq=8, hidden_dim=32, state_dim=16.
    #    hidden < 128 and state_dim % 8 == 0 -> lane-dense row-group path (g=8).
    T, hidden_dim, state_dim = 8, 32, 16
    z = jax.random.normal(key, (T, hidden_dim), dtype=jnp.float32)
    out = jax.block_until_ready(decoder_forward(z, state_dim))
    assert out.shape == (T, state_dim), out.shape
    assert jnp.allclose(out, z[:, :state_dim]), "mismatch vs reference slice (group)"

    # 2) Identity fast path (state_dim == hidden_dim): no kernel launch.
    out_id = jax.block_until_ready(decoder_forward(z, hidden_dim))
    assert jnp.allclose(out_id, z), "mismatch on identity fast path"

    # 3) Lane-restricted input (state_dim % 128 == 0) + 2-step grid so both
    #    v7x TensorCores participate.
    T2, hidden2, state2 = 4096, 256, 128
    z2 = jax.random.normal(jax.random.PRNGKey(0), (T2, hidden2), dtype=jnp.float32)
    out2 = jax.block_until_ready(decoder_forward(z2, state2))
    assert out2.shape == (T2, state2), out2.shape
    assert jnp.allclose(out2, z2[:, :state2]), "mismatch vs reference slice (tiled)"

    # 4) Non-multiple T with a ragged last tile, hidden % 128 == 0 -> only the
    #    first 128 lanes are DMA'd, slice done in-kernel.
    T3, hidden3, state3 = 10000, 512, 40
    z3 = jax.random.normal(jax.random.PRNGKey(0), (T3, hidden3), dtype=jnp.float32)
    out3 = jax.block_until_ready(decoder_forward(z3, state3))
    assert out3.shape == (T3, state3), out3.shape
    assert jnp.allclose(out3, z3[:, :state3]), "mismatch vs reference slice (ragged)"

    print("KERNEL_OK")
</pallas_src>

<mosaic_0001>
module attributes {stable_mosaic.version = 11 : i64} {
  func.func @_group_kernel(%arg0: i32, %arg1: memref<1x256xf32, #tpu.memory_space<vmem>>, %arg2: memref<1x128xf32, #tpu.memory_space<vmem>>) attributes {dimension_semantics = [#tpu.dimension_semantics<parallel>], iteration_bounds = array<i64: 1>, scalar_prefetch = 0 : i64, scratch_operands = 0 : i64, tpu.core_type = #tpu.core_type<tc>, window_params = [{transform_indices = @transform_0, window_bounds = array<i64: 1, 256>}, {transform_indices = @transform_1, window_bounds = array<i64: 1, 128>}]} {
    %c0 = arith.constant 0 : index
    %c0_0 = arith.constant 0 : index
    %0 = vector.load %arg1[%c0, %c0_0] : memref<1x256xf32, #tpu.memory_space<vmem>>, vector<1x16xf32>
    %c0_1 = arith.constant 0 : index
    %c0_2 = arith.constant 0 : index
    %1 = vector.load %arg2[%c0_1, %c0_2] : memref<1x128xf32, #tpu.memory_space<vmem>>, vector<1x16xf32>
    tpu.vector_store %arg2[%c0_1, %c0_2], %0 {strides = array<i32>} : memref<1x128xf32, #tpu.memory_space<vmem>>, vector<1x16xf32>,
    %c0_3 = arith.constant 0 : index
    %c32 = arith.constant 32 : index
    %2 = vector.load %arg1[%c0_3, %c32] : memref<1x256xf32, #tpu.memory_space<vmem>>, vector<1x16xf32>
    %c0_4 = arith.constant 0 : index
    %c16 = arith.constant 16 : index
    %3 = vector.load %arg2[%c0_4, %c16] : memref<1x128xf32, #tpu.memory_space<vmem>>, vector<1x16xf32>
    tpu.vector_store %arg2[%c0_4, %c16], %2 {strides = array<i32>} : memref<1x128xf32, #tpu.memory_space<vmem>>, vector<1x16xf32>,
    %c0_5 = arith.constant 0 : index
    %c64 = arith.constant 64 : index
    %4 = vector.load %arg1[%c0_5, %c64] : memref<1x256xf32, #tpu.memory_space<vmem>>, vector<1x16xf32>
    %c0_6 = arith.constant 0 : index
    %c32_7 = arith.constant 32 : index
    %5 = vector.load %arg2[%c0_6, %c32_7] : memref<1x128xf32, #tpu.memory_space<vmem>>, vector<1x16xf32>
    tpu.vector_store %arg2[%c0_6, %c32_7], %4 {strides = array<i32>} : memref<1x128xf32, #tpu.memory_space<vmem>>, vector<1x16xf32>,
    %c0_8 = arith.constant 0 : index
    %c96 = arith.constant 96 : index
    %6 = vector.load %arg1[%c0_8, %c96] : memref<1x256xf32, #tpu.memory_space<vmem>>, vector<1x16xf32>
    %c0_9 = arith.constant 0 : index
    %c48 = arith.constant 48 : index
    %7 = vector.load %arg2[%c0_9, %c48] : memref<1x128xf32, #tpu.memory_space<vmem>>, vector<1x16xf32>
    tpu.vector_store %arg2[%c0_9, %c48], %6 {strides = array<i32>} : memref<1x128xf32, #tpu.memory_space<vmem>>, vector<1x16xf32>,
    %c0_10 = arith.constant 0 : index
    %c128 = arith.constant 128 : index
    %8 = vector.load %arg1[%c0_10, %c128] : memref<1x256xf32, #tpu.memory_space<vmem>>, vector<1x16xf32>
    %c0_11 = arith.constant 0 : index
    %c64_12 = arith.constant 64 : index
    %9 = vector.load %arg2[%c0_11, %c64_12] : memref<1x128xf32, #tpu.memory_space<vmem>>, vector<1x16xf32>
    tpu.vector_store %arg2[%c0_11, %c64_12], %8 {strides = array<i32>} : memref<1x128xf32, #tpu.memory_space<vmem>>, vector<1x16xf32>,
    %c0_13 = arith.constant 0 : index
    %c160 = arith.constant 160 : index
    %10 = vector.load %arg1[%c0_13, %c160] : memref<1x256xf32, #tpu.memory_space<vmem>>, vector<1x16xf32>
    %c0_14 = arith.constant 0 : index
    %c80 = arith.constant 80 : index
    %11 = vector.load %arg2[%c0_14, %c80] : memref<1x128xf32, #tpu.memory_space<vmem>>, vector<1x16xf32>
    tpu.vector_store %arg2[%c0_14, %c80], %10 {strides = array<i32>} : memref<1x128xf32, #tpu.memory_space<vmem>>, vector<1x16xf32>,
    %c0_15 = arith.constant 0 : index
    %c192 = arith.constant 192 : index
    %12 = vector.load %arg1[%c0_15, %c192] : memref<1x256xf32, #tpu.memory_space<vmem>>, vector<1x16xf32>
    %c0_16 = arith.constant 0 : index
    %c96_17 = arith.constant 96 : index
    %13 = vector.load %arg2[%c0_16, %c96_17] : memref<1x128xf32, #tpu.memory_space<vmem>>, vector<1x16xf32>
    tpu.vector_store %arg2[%c0_16, %c96_17], %12 {strides = array<i32>} : memref<1x128xf32, #tpu.memory_space<vmem>>, vector<1x16xf32>,
    %c0_18 = arith.constant 0 : index
    %c224 = arith.constant 224 : index
    %14 = vector.load %arg1[%c0_18, %c224] : memref<1x256xf32, #tpu.memory_space<vmem>>, vector<1x16xf32>
    %c0_19 = arith.constant 0 : index
    %c112 = arith.constant 112 : index
    %15 = vector.load %arg2[%c0_19, %c112] : memref<1x128xf32, #tpu.memory_space<vmem>>, vector<1x16xf32>
    tpu.vector_store %arg2[%c0_19, %c112], %14 {strides = array<i32>} : memref<1x128xf32, #tpu.memory_space<vmem>>, vector<1x16xf32>,
    return
  }
  func.func @transform_0(%arg0: i32) -> (i32, i32) {
    %c0_i32 = arith.constant 0 : i32
    %c0_i32_0 = arith.constant 0 : i32
    return %arg0, %c0_i32 : i32, i32
  }
  func.func @transform_1(%arg0: i32) -> (i32, i32) {
    %c0_i32 = arith.constant 0 : i32
    %c0_i32_0 = arith.constant 0 : i32
    return %arg0, %c0_i32 : i32, i32
  }
}

</mosaic_0001>

<bundles_post_ra>
// kernel: tpu_custom_call.1
= control target key start
LH: loop header
LB: loop body
LE: loop exit
PB: predicated region body
PF: predicated region fallthrough
CT: control target
= control target key end

     0   :  { %6 = vsyncpa [#allocation3], 0  ;;  %s201_s0 = inlined_call_operand.hbm [shape: f32[1,256], index: 0, kind: input, shape index: {}]   ;;  %s202_s1 = inlined_call_operand.hbm [shape: f32[1,128], index: 1, kind: output, shape index: {}]  }
   0x1   :  { %7 = vsyncpa [#allocation4], 0  ;;  %s176_s6 = smov [#allocation2]  }
   0x2   :  { %s14_s7 = sshll.u32 %s176_s6, 4  ;;  %s15_s7 = int_to_ptr.vmem [resolvable:$true] %s14_s7 }
   0x3   :  { %s140_s8 = scalar_lea.vmem %s15_s7, 32  ;;  %p145_p1 = scmp.lt.s32.totalorder %s15_s7, %s15_s7 }
   0x4   :  { %p141_p0 = scmp.ne.s32.totalorder %s15_s7, %s140_s8  ;;  %p146_p2 = scmp.lt.s32.totalorder %s140_s8, %s140_s8 }
   0x6   :  { %p147_p3 = por %p146_p2, %p145_p1 }
   0x8   :  { %p148_p4 = pnand %p147_p3, %p141_p0 }
   0xa   :  { %151 = shalt.err (!%p148_p4)
}
   0xb   :  { %17 = dma.hbm_to_vmem [thread:$0]  %s201_s0, 32, %s15_s7, [#allocation3]  }
   0xc   :  { %172 = dma.done.wait [#allocation3], 32  }
   0xd   :  { %173 = vsyncadd [#allocation3], 4294967264  ;;  %vm22_vm0 = vcmask 122880   ;;  %v116_v0 = vld [vmem:[#allocation2] ss:$0 sm:$0xff]  ;;  %s177_s11 = smov 112  }
   0xe   :  { %v21_v1 = vld [vmem:[#allocation2] sm:$0x1]  ;;  %30 = vrot.lane.b32.xlu0 %v116_v0, %s177_s11  ;;  %s178_s12 = smov 80   ;;  %v119_v2 = vld [vmem:[#allocation2 + $0x1] ss:$0 sm:$0xff]  ;;  %s179_s13 = smov 96  }
   0xf   :  { %52 = vrot.lane.b32.xlu1 %v116_v0, %s178_s12  ;;  %23 = vst.msk [vmem:[#allocation5] sm:$0x1] %vm22_vm0, %v21_v1  ;;  %s180_s14 = smov 64   ;;  %s181_s15 = smov 48   ;;  %vm33_vm1 = vcmask 254080   ;;  %vm44_vm2 = vcmask 385280  }
  0x10   :  { %s182_s16 = smov 32   ;;  %s183_s0 = smov 16   ;;  %vm55_vm3 = vcmask 516480   ;;  %vm66_vm4 = vcmask 647680   ;;  %vm77_vm5 = vcmask 778880   ;;  %vm88_vm6 = vcmask 910080  }
  0x11   :  { %s184_s17 = smov [#allocation5]   ;;  %vm99_vm7 = vcmask 1041280  }
  0x12   :  { %41 = vrot.lane.b32.xlu0 %v116_v0, %s179_s13  ;;  %s107_s18 = sshll.u32 %s184_s17, 4  ;;  %s108_s18 = int_to_ptr.vmem [resolvable:$true] %s107_s18 }
  0x13   :  { %63 = vrot.lane.b32.xlu1 %v119_v2, %s180_s14  ;;  %s152_s19 = scalar_lea.vmem %s108_s18, 16  ;;  %s156_s20 = scalar_lea.vmem %s108_s18, 32 }
  0x14   :  { %p153_p5 = scmp.ne.s32.totalorder %s108_s18, %s152_s19  ;;  %p157_p6 = scmp.lt.s32.totalorder %s108_s18, %s108_s18 }
  0x15   :  { %p158_p7 = scmp.lt.s32.totalorder %s156_s20, %s152_s19 }
  0x16   :  { %74 = vrot.lane.b32.xlu0 %v119_v2, %s181_s15 }
  0x17   :  { %85 = vrot.lane.b32.xlu1 %v119_v2, %s182_s16  ;;  %p159_p8 = por %p158_p7, %p157_p6 }
  0x19   :  { %p160_p9 = pnand %p159_p8, %p153_p5 }
  0x1a   :  { %96 = vrot.lane.b32.xlu0 %v119_v2, %s183_s0 }
  0x80   :  { %v31_v3 = vpop.permute.xlu0 %30 }
  0x81   :  { %v53_v4 = vpop.permute.xlu1 %52  ;;  %34 = vst.msk [vmem:[#allocation5] sm:$0x1] %vm33_vm1, %v31_v3 }
  0x84   :  { %v42_v5 = vpop.permute.xlu0 %41 }
  0x85   :  { %v64_v6 = vpop.permute.xlu1 %63  ;;  %45 = vst.msk [vmem:[#allocation5] sm:$0x1] %vm44_vm2, %v42_v5 }
  0x86   :  { %56 = vst.msk [vmem:[#allocation5] sm:$0x1] %vm55_vm3, %v53_v4 }
  0x87   :  { %67 = vst.msk [vmem:[#allocation5] sm:$0x1] %vm66_vm4, %v64_v6 }
  0x88   :  { %v75_v7 = vpop.permute.xlu0 %74 }
  0x89   :  { %v86_v8 = vpop.permute.xlu1 %85  ;;  %78 = vst.msk [vmem:[#allocation5] sm:$0x1] %vm77_vm5, %v75_v7 }
  0x8a   :  { %89 = vst.msk [vmem:[#allocation5] sm:$0x1] %vm88_vm6, %v86_v8 }
  0x8c   :  { %v97_v9 = vpop.permute.xlu0 %96 }
  0x8d   :  { %100 = vst.msk [vmem:[#allocation5] sm:$0x1] %vm99_vm7, %v97_v9 }
  0x8e   :  { %163 = shalt.err (!%p160_p9)
}
  0x8f   :  { %110 = dma.vmem_to_hbm [thread:$0]  %s108_s18, 16, %s202_s1, [#allocation4]  }
  0x90   :  { %174 = dma.done.wait [#allocation4], 16  }
  0x91   :  { %175 = vsyncadd [#allocation4], 4294967280 }
  0x92   :  { %114 = vsyncpa [#allocation3], 1 }
  0x93   :  { %115 = vsyncpa [#allocation4], 1 }

</bundles_post_ra>
